<compile_context>
chip_gen: v7x
topology: tpu7x:2x2x1
jax: 0.10.0
libtpu: 0.0.40
codegen_flags: <defaults>
</compile_context>

<pallas_src>
import functools

import jax
import jax.numpy as jnp
import numpy as np
from jax.experimental import pallas as pl
from jax.experimental.pallas import tpu as pltpu

# Model hyper-parameters (match the PyTorch module defaults).
EMBEDDING_DIM = 64          # D
HIDDEN_SIZE = 20            # H
INPUT_SIZE_USER = 10        # IU
NUM_ITEMS = 1000
NUM_USER_TASKS = 4          # T
NUM_USER_EMBEDDINGS = 3     # E
BATCH = 32                  # B


def _ranker_kernel(ids_ref, uf_ref, emb_ref, mlp1_ref, mlp2_ref, head_ref,
                   out_ref, item_scr,
                   *, num_user_embeddings, embedding_dim, hidden_size,
                   input_size_user, batch):
    """Single-block kernel: everything lives in VMEM (shapes are tiny)."""
    E, D, H, IU, B = (num_user_embeddings, embedding_dim, hidden_size,
                      input_size_user, batch)

    # ---- in-kernel embedding gather ------------------------------------------
    # Table is VMEM-resident (256 KB); ids come from SMEM.  One dynamic-sublane
    # row load per batch element into a (B, D) VMEM scratch.
    for b in range(B):
        idx = ids_ref[b]
        item_scr[pl.ds(b, 1), :] = emb_ref[pl.ds(idx, 1), :]
    item = item_scr[...]                                           # (B, D)

    uf = uf_ref[...]                                               # (B, IU)

    # ---- user MLP: Linear -> ReLU --------------------------------------------
    w1 = mlp1_ref[0:IU, :]                                         # (IU, H)
    b1 = mlp1_ref[IU:IU + 1, :]                                    # (1, H)
    h = jnp.dot(uf, w1, preferred_element_type=jnp.float32) + b1
    h = jnp.maximum(h, 0.0)                                        # (B, H)

    # ---- per-mode second Linear + per-mode dot products ----------------------
    # w2/b2 arrive pre-split along E, so there are no lane-offset slices of a
    # (B, E*D) activation and no (B,1)->(B,E) concatenation.
    ue, dots = [], []
    for e in range(E):
        w2_e = mlp2_ref[e, 0:H, :]                                 # (H, D)
        b2_e = mlp2_ref[e, H:H + 1, :]                             # (1, D)
        ue_e = jnp.dot(h, w2_e, preferred_element_type=jnp.float32) + b2_e
        ue.append(ue_e)                                            # (B, D)
        dots.append(jnp.sum(ue_e * item, axis=-1, keepdims=True))  # (B, 1)

    # ---- softmax over the E modes (elementwise across the E arrays) ----------
    # Normalization is folded into the combine via one approx reciprocal (EUP).
    m = functools.reduce(jnp.maximum, dots)                        # (B, 1)
    p = [jnp.exp(d - m) for d in dots]
    inv_denom = pl.reciprocal(functools.reduce(jnp.add, p), approx=True)
    acc = functools.reduce(jnp.add, [pe * ue_e for pe, ue_e in zip(p, ue)])
    combined = acc * inv_denom                                     # (B, D)

    # ---- multitask head -------------------------------------------------------
    # One K = 2*D = 128 matmul over [combined | item] (single lane splice),
    # plus E broadcast FMAs for the dots part of the weight, plus the bias.
    ci = jnp.concatenate([combined, item], axis=-1)                # (B, 2D)
    w3_ci = head_ref[0:2 * D, :]                                   # (2D, T)
    logits = jnp.dot(ci, w3_ci, preferred_element_type=jnp.float32)
    for e in range(E):
        logits = logits + dots[e] * head_ref[2 * D + e:2 * D + e + 1, :]
    logits = logits + head_ref[2 * D + E:2 * D + E + 1, :]         # + b3
    out_ref[...] = logits                                          # (B, T)


def multitask_early_ranker(user_features, item_ids, packed):
    """Wrapper: the whole forward pass (including the gather) in one Pallas call."""
    B = user_features.shape[0]
    kernel = functools.partial(
        _ranker_kernel,
        num_user_embeddings=NUM_USER_EMBEDDINGS,
        embedding_dim=EMBEDDING_DIM,
        hidden_size=HIDDEN_SIZE,
        input_size_user=INPUT_SIZE_USER,
        batch=B,
    )
    vmem = pl.BlockSpec(memory_space=pltpu.MemorySpace.VMEM)
    smem = pl.BlockSpec(memory_space=pltpu.MemorySpace.SMEM)
    # NOTE(perf): no grid -- inputs + 256 KB table + <100 KB packed weights fit
    # VMEM on v5e/v6e/v7x.  If batch is scaled up for real serving, add a batch
    # grid with dimension_semantics=("parallel",) so v7x's two TensorCores
    # share it, and make the output lane-dense.
    return pl.pallas_call(
        kernel,
        out_shape=jax.ShapeDtypeStruct((B, NUM_USER_TASKS), jnp.float32),
        in_specs=[smem, vmem, vmem, vmem, vmem, vmem],
        out_specs=vmem,
        scratch_shapes=[pltpu.VMEM((B, EMBEDDING_DIM), jnp.float32)],
    )(item_ids, user_features, packed["emb_table"],
      packed["p_mlp1"], packed["p_mlp2"], packed["p_head"])


def init_params(key):
    """Deterministic synthetic parameters (natural shapes, per PyTorch __init__)."""
    ks = jax.random.split(key, 8)
    E, D, H, IU, T = (NUM_USER_EMBEDDINGS, EMBEDDING_DIM, HIDDEN_SIZE,
                      INPUT_SIZE_USER, NUM_USER_TASKS)
    w1 = jax.random.normal(ks[0], (IU, H), jnp.float32) * 0.1
    b1 = jax.random.normal(ks[1], (1, H), jnp.float32) * 0.1
    w2 = jax.random.normal(ks[2], (H, E * D), jnp.float32) * 0.1
    b2 = jax.random.normal(ks[3], (1, E * D), jnp.float32) * 0.1
    w3 = jax.random.normal(ks[4], (2 * D + E, T), jnp.float32) * 0.1
    b3 = jax.random.normal(ks[5], (1, T), jnp.float32) * 0.1
    emb_table = jax.random.normal(ks[6], (NUM_ITEMS, D), jnp.float32)
    return {"w1": w1, "b1": b1, "w2": w2, "b2": b2, "w3": w3, "b3": b3,
            "emb_table": emb_table}


def pack_params(params):
    """Host-side packing / pre-splitting of parameters for the kernel."""
    E, D, H = NUM_USER_EMBEDDINGS, EMBEDDING_DIM, HIDDEN_SIZE
    p_mlp1 = jnp.concatenate([params["w1"], params["b1"]], axis=0)      # (IU+1, H)
    pieces = []
    for e in range(E):
        w2_e = params["w2"][:, e * D:(e + 1) * D]                       # (H, D)
        b2_e = params["b2"][:, e * D:(e + 1) * D]                       # (1, D)
        pieces.append(jnp.concatenate([w2_e, b2_e], axis=0)[None])      # (1, H+1, D)
    p_mlp2 = jnp.concatenate(pieces, axis=0)                            # (E, H+1, D)
    p_head = jnp.concatenate([params["w3"], params["b3"]], axis=0)      # (2D+E+1, T)
    return {"p_mlp1": p_mlp1, "p_mlp2": p_mlp2, "p_head": p_head,
            "emb_table": params["emb_table"]}


def reference_forward(user_features, item_ids, params):
    """Pure-JAX reference mirroring the PyTorch forward, for validation."""
    E, D = NUM_USER_EMBEDDINGS, EMBEDDING_DIM
    h = jnp.maximum(user_features @ params["w1"] + params["b1"], 0.0)
    ue = (h @ params["w2"] + params["b2"]).reshape(-1, E, D)        # (B, E, D)
    item = jnp.take(params["emb_table"], item_ids, axis=0)          # (B, D)
    dots = jnp.einsum("bed,bd->be", ue, item)                       # (B, E)
    w = jax.nn.softmax(dots, axis=1)
    combined = jnp.einsum("bed,be->bd", ue, w)                      # (B, D)
    concat = jnp.concatenate([combined, item, dots], axis=1)        # (B, 2D+E)
    return concat @ params["w3"] + params["b3"]


if __name__ == "__main__":
    key = jax.random.PRNGKey(0)
    k_params, k_uf, k_ids = jax.random.split(key, 3)

    params = init_params(k_params)
    packed = pack_params(params)
    user_features = jax.random.normal(k_uf, (BATCH, INPUT_SIZE_USER), jnp.float32)
    item_ids = jax.random.randint(k_ids, (BATCH,), 0, NUM_ITEMS, jnp.int32)

    out = multitask_early_ranker(user_features, item_ids, packed)
    out = jax.block_until_ready(out)

    ref = reference_forward(user_features, item_ids, params)
    # Tolerance relaxed (was 1e-5) because the softmax denominator now uses the
    # EUP approximate reciprocal, per the performance review.
    np.testing.assert_allclose(np.asarray(out), np.asarray(ref),
                               rtol=2e-2, atol=2e-2)
    print("KERNEL_OK")
</pallas_src>

<mosaic_0001>
module attributes {stable_mosaic.version = 11 : i64} {
  func.func @_ranker_kernel(%arg0: memref<32xi32, #tpu.memory_space<smem>>, %arg1: memref<32x10xf32, #tpu.memory_space<vmem>>, %arg2: memref<1000x64xf32, #tpu.memory_space<vmem>>, %arg3: memref<11x20xf32, #tpu.memory_space<vmem>>, %arg4: memref<3x21x64xf32, #tpu.memory_space<vmem>>, %arg5: memref<132x4xf32, #tpu.memory_space<vmem>>, %arg6: memref<32x4xf32, #tpu.memory_space<vmem>>, %arg7: memref<32x64xf32, #tpu.memory_space<vmem>>) attributes {dimension_semantics = [], scalar_prefetch = 0 : i64, scratch_operands = 1 : i64, tpu.core_type = #tpu.core_type<tc>} {
    %c0 = arith.constant 0 : index
    %0 = memref.load %arg0[%c0] : memref<32xi32, #tpu.memory_space<smem>>
    %1 = arith.index_cast %0 : i32 to index
    %c0_0 = arith.constant 0 : index
    %2 = vector.load %arg2[%1, %c0_0] : memref<1000x64xf32, #tpu.memory_space<vmem>>, vector<1x64xf32>
    %c0_1 = arith.constant 0 : index
    %c0_2 = arith.constant 0 : index
    %3 = vector.load %arg7[%c0_1, %c0_2] : memref<32x64xf32, #tpu.memory_space<vmem>>, vector<1x64xf32>
    tpu.vector_store %arg7[%c0_1, %c0_2], %2 {strides = array<i32>} : memref<32x64xf32, #tpu.memory_space<vmem>>, vector<1x64xf32>,
    %c1 = arith.constant 1 : index
    %4 = memref.load %arg0[%c1] : memref<32xi32, #tpu.memory_space<smem>>
    %5 = arith.index_cast %4 : i32 to index
    %c0_3 = arith.constant 0 : index
    %6 = vector.load %arg2[%5, %c0_3] : memref<1000x64xf32, #tpu.memory_space<vmem>>, vector<1x64xf32>
    %c1_4 = arith.constant 1 : index
    %c0_5 = arith.constant 0 : index
    %7 = vector.load %arg7[%c1_4, %c0_5] : memref<32x64xf32, #tpu.memory_space<vmem>>, vector<1x64xf32>
    tpu.vector_store %arg7[%c1_4, %c0_5], %6 {strides = array<i32>} : memref<32x64xf32, #tpu.memory_space<vmem>>, vector<1x64xf32>,
    %c2 = arith.constant 2 : index
    %8 = memref.load %arg0[%c2] : memref<32xi32, #tpu.memory_space<smem>>
    %9 = arith.index_cast %8 : i32 to index
    %c0_6 = arith.constant 0 : index
    %10 = vector.load %arg2[%9, %c0_6] : memref<1000x64xf32, #tpu.memory_space<vmem>>, vector<1x64xf32>
    %c2_7 = arith.constant 2 : index
    %c0_8 = arith.constant 0 : index
    %11 = vector.load %arg7[%c2_7, %c0_8] : memref<32x64xf32, #tpu.memory_space<vmem>>, vector<1x64xf32>
    tpu.vector_store %arg7[%c2_7, %c0_8], %10 {strides = array<i32>} : memref<32x64xf32, #tpu.memory_space<vmem>>, vector<1x64xf32>,
    %c3 = arith.constant 3 : index
    %12 = memref.load %arg0[%c3] : memref<32xi32, #tpu.memory_space<smem>>
    %13 = arith.index_cast %12 : i32 to index
    %c0_9 = arith.constant 0 : index
    %14 = vector.load %arg2[%13, %c0_9] : memref<1000x64xf32, #tpu.memory_space<vmem>>, vector<1x64xf32>
    %c3_10 = arith.constant 3 : index
    %c0_11 = arith.constant 0 : index
    %15 = vector.load %arg7[%c3_10, %c0_11] : memref<32x64xf32, #tpu.memory_space<vmem>>, vector<1x64xf32>
    tpu.vector_store %arg7[%c3_10, %c0_11], %14 {strides = array<i32>} : memref<32x64xf32, #tpu.memory_space<vmem>>, vector<1x64xf32>,
    %c4 = arith.constant 4 : index
    %16 = memref.load %arg0[%c4] : memref<32xi32, #tpu.memory_space<smem>>
    %17 = arith.index_cast %16 : i32 to index
    %c0_12 = arith.constant 0 : index
    %18 = vector.load %arg2[%17, %c0_12] : memref<1000x64xf32, #tpu.memory_space<vmem>>, vector<1x64xf32>
    %c4_13 = arith.constant 4 : index
    %c0_14 = arith.constant 0 : index
    %19 = vector.load %arg7[%c4_13, %c0_14] : memref<32x64xf32, #tpu.memory_space<vmem>>, vector<1x64xf32>
    tpu.vector_store %arg7[%c4_13, %c0_14], %18 {strides = array<i32>} : memref<32x64xf32, #tpu.memory_space<vmem>>, vector<1x64xf32>,
    %c5 = arith.constant 5 : index
    %20 = memref.load %arg0[%c5] : memref<32xi32, #tpu.memory_space<smem>>
    %21 = arith.index_cast %20 : i32 to index
    %c0_15 = arith.constant 0 : index
    %22 = vector.load %arg2[%21, %c0_15] : memref<1000x64xf32, #tpu.memory_space<vmem>>, vector<1x64xf32>
    %c5_16 = arith.constant 5 : index
    %c0_17 = arith.constant 0 : index
    %23 = vector.load %arg7[%c5_16, %c0_17] : memref<32x64xf32, #tpu.memory_space<vmem>>, vector<1x64xf32>
    tpu.vector_store %arg7[%c5_16, %c0_17], %22 {strides = array<i32>} : memref<32x64xf32, #tpu.memory_space<vmem>>, vector<1x64xf32>,
    %c6 = arith.constant 6 : index
    %24 = memref.load %arg0[%c6] : memref<32xi32, #tpu.memory_space<smem>>
    %25 = arith.index_cast %24 : i32 to index
    %c0_18 = arith.constant 0 : index
    %26 = vector.load %arg2[%25, %c0_18] : memref<1000x64xf32, #tpu.memory_space<vmem>>, vector<1x64xf32>
    %c6_19 = arith.constant 6 : index
    %c0_20 = arith.constant 0 : index
    %27 = vector.load %arg7[%c6_19, %c0_20] : memref<32x64xf32, #tpu.memory_space<vmem>>, vector<1x64xf32>
    tpu.vector_store %arg7[%c6_19, %c0_20], %26 {strides = array<i32>} : memref<32x64xf32, #tpu.memory_space<vmem>>, vector<1x64xf32>,
    %c7 = arith.constant 7 : index
    %28 = memref.load %arg0[%c7] : memref<32xi32, #tpu.memory_space<smem>>
    %29 = arith.index_cast %28 : i32 to index
    %c0_21 = arith.constant 0 : index
    %30 = vector.load %arg2[%29, %c0_21] : memref<1000x64xf32, #tpu.memory_space<vmem>>, vector<1x64xf32>
    %c7_22 = arith.constant 7 : index
    %c0_23 = arith.constant 0 : index
    %31 = vector.load %arg7[%c7_22, %c0_23] : memref<32x64xf32, #tpu.memory_space<vmem>>, vector<1x64xf32>
    tpu.vector_store %arg7[%c7_22, %c0_23], %30 {strides = array<i32>} : memref<32x64xf32, #tpu.memory_space<vmem>>, vector<1x64xf32>,
    %c8 = arith.constant 8 : index
    %32 = memref.load %arg0[%c8] : memref<32xi32, #tpu.memory_space<smem>>
    %33 = arith.index_cast %32 : i32 to index
    %c0_24 = arith.constant 0 : index
    %34 = vector.load %arg2[%33, %c0_24] : memref<1000x64xf32, #tpu.memory_space<vmem>>, vector<1x64xf32>
    %c8_25 = arith.constant 8 : index
    %c0_26 = arith.constant 0 : index
    %35 = vector.load %arg7[%c8_25, %c0_26] : memref<32x64xf32, #tpu.memory_space<vmem>>, vector<1x64xf32>
    tpu.vector_store %arg7[%c8_25, %c0_26], %34 {strides = array<i32>} : memref<32x64xf32, #tpu.memory_space<vmem>>, vector<1x64xf32>,
    %c9 = arith.constant 9 : index
    %36 = memref.load %arg0[%c9] : memref<32xi32, #tpu.memory_space<smem>>
    %37 = arith.index_cast %36 : i32 to index
    %c0_27 = arith.constant 0 : index
    %38 = vector.load %arg2[%37, %c0_27] : memref<1000x64xf32, #tpu.memory_space<vmem>>, vector<1x64xf32>
    %c9_28 = arith.constant 9 : index
    %c0_29 = arith.constant 0 : index
    %39 = vector.load %arg7[%c9_28, %c0_29] : memref<32x64xf32, #tpu.memory_space<vmem>>, vector<1x64xf32>
    tpu.vector_store %arg7[%c9_28, %c0_29], %38 {strides = array<i32>} : memref<32x64xf32, #tpu.memory_space<vmem>>, vector<1x64xf32>,
    %c10 = arith.constant 10 : index
    %40 = memref.load %arg0[%c10] : memref<32xi32, #tpu.memory_space<smem>>
    %41 = arith.index_cast %40 : i32 to index
    %c0_30 = arith.constant 0 : index
    %42 = vector.load %arg2[%41, %c0_30] : memref<1000x64xf32, #tpu.memory_space<vmem>>, vector<1x64xf32>
    %c10_31 = arith.constant 10 : index
    %c0_32 = arith.constant 0 : index
    %43 = vector.load %arg7[%c10_31, %c0_32] : memref<32x64xf32, #tpu.memory_space<vmem>>, vector<1x64xf32>
    tpu.vector_store %arg7[%c10_31, %c0_32], %42 {strides = array<i32>} : memref<32x64xf32, #tpu.memory_space<vmem>>, vector<1x64xf32>,
    %c11 = arith.constant 11 : index
    %44 = memref.load %arg0[%c11] : memref<32xi32, #tpu.memory_space<smem>>
    %45 = arith.index_cast %44 : i32 to index
    %c0_33 = arith.constant 0 : index
    %46 = vector.load %arg2[%45, %c0_33] : memref<1000x64xf32, #tpu.memory_space<vmem>>, vector<1x64xf32>
    %c11_34 = arith.constant 11 : index
    %c0_35 = arith.constant 0 : index
    %47 = vector.load %arg7[%c11_34, %c0_35] : memref<32x64xf32, #tpu.memory_space<vmem>>, vector<1x64xf32>
    tpu.vector_store %arg7[%c11_34, %c0_35], %46 {strides = array<i32>} : memref<32x64xf32, #tpu.memory_space<vmem>>, vector<1x64xf32>,
    %c12 = arith.constant 12 : index
    %48 = memref.load %arg0[%c12] : memref<32xi32, #tpu.memory_space<smem>>
    %49 = arith.index_cast %48 : i32 to index
    %c0_36 = arith.constant 0 : index
    %50 = vector.load %arg2[%49, %c0_36] : memref<1000x64xf32, #tpu.memory_space<vmem>>, vector<1x64xf32>
    %c12_37 = arith.constant 12 : index
    %c0_38 = arith.constant 0 : index
    %51 = vector.load %arg7[%c12_37, %c0_38] : memref<32x64xf32, #tpu.memory_space<vmem>>, vector<1x64xf32>
    tpu.vector_store %arg7[%c12_37, %c0_38], %50 {strides = array<i32>} : memref<32x64xf32, #tpu.memory_space<vmem>>, vector<1x64xf32>,
    %c13 = arith.constant 13 : index
    %52 = memref.load %arg0[%c13] : memref<32xi32, #tpu.memory_space<smem>>
    %53 = arith.index_cast %52 : i32 to index
    %c0_39 = arith.constant 0 : index
    %54 = vector.load %arg2[%53, %c0_39] : memref<1000x64xf32, #tpu.memory_space<vmem>>, vector<1x64xf32>
    %c13_40 = arith.constant 13 : index
    %c0_41 = arith.constant 0 : index
    %55 = vector.load %arg7[%c13_40, %c0_41] : memref<32x64xf32, #tpu.memory_space<vmem>>, vector<1x64xf32>
    tpu.vector_store %arg7[%c13_40, %c0_41], %54 {strides = array<i32>} : memref<32x64xf32, #tpu.memory_space<vmem>>, vector<1x64xf32>,
    %c14 = arith.constant 14 : index
    %56 = memref.load %arg0[%c14] : memref<32xi32, #tpu.memory_space<smem>>
    %57 = arith.index_cast %56 : i32 to index
    %c0_42 = arith.constant 0 : index
    %58 = vector.load %arg2[%57, %c0_42] : memref<1000x64xf32, #tpu.memory_space<vmem>>, vector<1x64xf32>
    %c14_43 = arith.constant 14 : index
    %c0_44 = arith.constant 0 : index
    %59 = vector.load %arg7[%c14_43, %c0_44] : memref<32x64xf32, #tpu.memory_space<vmem>>, vector<1x64xf32>
    tpu.vector_store %arg7[%c14_43, %c0_44], %58 {strides = array<i32>} : memref<32x64xf32, #tpu.memory_space<vmem>>, vector<1x64xf32>,
    %c15 = arith.constant 15 : index
    %60 = memref.load %arg0[%c15] : memref<32xi32, #tpu.memory_space<smem>>
    %61 = arith.index_cast %60 : i32 to index
    %c0_45 = arith.constant 0 : index
    %62 = vector.load %arg2[%61, %c0_45] : memref<1000x64xf32, #tpu.memory_space<vmem>>, vector<1x64xf32>
    %c15_46 = arith.constant 15 : index
    %c0_47 = arith.constant 0 : index
    %63 = vector.load %arg7[%c15_46, %c0_47] : memref<32x64xf32, #tpu.memory_space<vmem>>, vector<1x64xf32>
    tpu.vector_store %arg7[%c15_46, %c0_47], %62 {strides = array<i32>} : memref<32x64xf32, #tpu.memory_space<vmem>>, vector<1x64xf32>,
    %c16 = arith.constant 16 : index
    %64 = memref.load %arg0[%c16] : memref<32xi32, #tpu.memory_space<smem>>
    %65 = arith.index_cast %64 : i32 to index
    %c0_48 = arith.constant 0 : index
    %66 = vector.load %arg2[%65, %c0_48] : memref<1000x64xf32, #tpu.memory_space<vmem>>, vector<1x64xf32>
    %c16_49 = arith.constant 16 : index
    %c0_50 = arith.constant 0 : index
    %67 = vector.load %arg7[%c16_49, %c0_50] : memref<32x64xf32, #tpu.memory_space<vmem>>, vector<1x64xf32>
    tpu.vector_store %arg7[%c16_49, %c0_50], %66 {strides = array<i32>} : memref<32x64xf32, #tpu.memory_space<vmem>>, vector<1x64xf32>,
    %c17 = arith.constant 17 : index
    %68 = memref.load %arg0[%c17] : memref<32xi32, #tpu.memory_space<smem>>
    %69 = arith.index_cast %68 : i32 to index
    %c0_51 = arith.constant 0 : index
    %70 = vector.load %arg2[%69, %c0_51] : memref<1000x64xf32, #tpu.memory_space<vmem>>, vector<1x64xf32>
    %c17_52 = arith.constant 17 : index
    %c0_53 = arith.constant 0 : index
    %71 = vector.load %arg7[%c17_52, %c0_53] : memref<32x64xf32, #tpu.memory_space<vmem>>, vector<1x64xf32>
    tpu.vector_store %arg7[%c17_52, %c0_53], %70 {strides = array<i32>} : memref<32x64xf32, #tpu.memory_space<vmem>>, vector<1x64xf32>,
    %c18 = arith.constant 18 : index
    %72 = memref.load %arg0[%c18] : memref<32xi32, #tpu.memory_space<smem>>
    %73 = arith.index_cast %72 : i32 to index
    %c0_54 = arith.constant 0 : index
    %74 = vector.load %arg2[%73, %c0_54] : memref<1000x64xf32, #tpu.memory_space<vmem>>, vector<1x64xf32>
    %c18_55 = arith.constant 18 : index
    %c0_56 = arith.constant 0 : index
    %75 = vector.load %arg7[%c18_55, %c0_56] : memref<32x64xf32, #tpu.memory_space<vmem>>, vector<1x64xf32>
    tpu.vector_store %arg7[%c18_55, %c0_56], %74 {strides = array<i32>} : memref<32x64xf32, #tpu.memory_space<vmem>>, vector<1x64xf32>,
    %c19 = arith.constant 19 : index
    %76 = memref.load %arg0[%c19] : memref<32xi32, #tpu.memory_space<smem>>
    %77 = arith.index_cast %76 : i32 to index
    %c0_57 = arith.constant 0 : index
    %78 = vector.load %arg2[%77, %c0_57] : memref<1000x64xf32, #tpu.memory_space<vmem>>, vector<1x64xf32>
    %c19_58 = arith.constant 19 : index
    %c0_59 = arith.constant 0 : index
    %79 = vector.load %arg7[%c19_58, %c0_59] : memref<32x64xf32, #tpu.memory_space<vmem>>, vector<1x64xf32>
    tpu.vector_store %arg7[%c19_58, %c0_59], %78 {strides = array<i32>} : memref<32x64xf32, #tpu.memory_space<vmem>>, vector<1x64xf32>,
    %c20 = arith.constant 20 : index
    %80 = memref.load %arg0[%c20] : memref<32xi32, #tpu.memory_space<smem>>
    %81 = arith.index_cast %80 : i32 to index
    %c0_60 = arith.constant 0 : index
    %82 = vector.load %arg2[%81, %c0_60] : memref<1000x64xf32, #tpu.memory_space<vmem>>, vector<1x64xf32>
    %c20_61 = arith.constant 20 : index
    %c0_62 = arith.constant 0 : index
    %83 = vector.load %arg7[%c20_61, %c0_62] : memref<32x64xf32, #tpu.memory_space<vmem>>, vector<1x64xf32>
    tpu.vector_store %arg7[%c20_61, %c0_62], %82 {strides = array<i32>} : memref<32x64xf32, #tpu.memory_space<vmem>>, vector<1x64xf32>,
    %c21 = arith.constant 21 : index
    %84 = memref.load %arg0[%c21] : memref<32xi32, #tpu.memory_space<smem>>
    %85 = arith.index_cast %84 : i32 to index
    %c0_63 = arith.constant 0 : index
    %86 = vector.load %arg2[%85, %c0_63] : memref<1000x64xf32, #tpu.memory_space<vmem>>, vector<1x64xf32>
    %c21_64 = arith.constant 21 : index
    %c0_65 = arith.constant 0 : index
    %87 = vector.load %arg7[%c21_64, %c0_65] : memref<32x64xf32, #tpu.memory_space<vmem>>, vector<1x64xf32>
    tpu.vector_store %arg7[%c21_64, %c0_65], %86 {strides = array<i32>} : memref<32x64xf32, #tpu.memory_space<vmem>>, vector<1x64xf32>,
    %c22 = arith.constant 22 : index
    %88 = memref.load %arg0[%c22] : memref<32xi32, #tpu.memory_space<smem>>
    %89 = arith.index_cast %88 : i32 to index
    %c0_66 = arith.constant 0 : index
    %90 = vector.load %arg2[%89, %c0_66] : memref<1000x64xf32, #tpu.memory_space<vmem>>, vector<1x64xf32>
    %c22_67 = arith.constant 22 : index
    %c0_68 = arith.constant 0 : index
    %91 = vector.load %arg7[%c22_67, %c0_68] : memref<32x64xf32, #tpu.memory_space<vmem>>, vector<1x64xf32>
    tpu.vector_store %arg7[%c22_67, %c0_68], %90 {strides = array<i32>} : memref<32x64xf32, #tpu.memory_space<vmem>>, vector<1x64xf32>,
    %c23 = arith.constant 23 : index
    %92 = memref.load %arg0[%c23] : memref<32xi32, #tpu.memory_space<smem>>
    %93 = arith.index_cast %92 : i32 to index
    %c0_69 = arith.constant 0 : index
    %94 = vector.load %arg2[%93, %c0_69] : memref<1000x64xf32, #tpu.memory_space<vmem>>, vector<1x64xf32>
    %c23_70 = arith.constant 23 : index
    %c0_71 = arith.constant 0 : index
    %95 = vector.load %arg7[%c23_70, %c0_71] : memref<32x64xf32, #tpu.memory_space<vmem>>, vector<1x64xf32>
    tpu.vector_store %arg7[%c23_70, %c0_71], %94 {strides = array<i32>} : memref<32x64xf32, #tpu.memory_space<vmem>>, vector<1x64xf32>,
    %c24 = arith.constant 24 : index
    %96 = memref.load %arg0[%c24] : memref<32xi32, #tpu.memory_space<smem>>
    %97 = arith.index_cast %96 : i32 to index
    %c0_72 = arith.constant 0 : index
    %98 = vector.load %arg2[%97, %c0_72] : memref<1000x64xf32, #tpu.memory_space<vmem>>, vector<1x64xf32>
    %c24_73 = arith.constant 24 : index
    %c0_74 = arith.constant 0 : index
    %99 = vector.load %arg7[%c24_73, %c0_74] : memref<32x64xf32, #tpu.memory_space<vmem>>, vector<1x64xf32>
    tpu.vector_store %arg7[%c24_73, %c0_74], %98 {strides = array<i32>} : memref<32x64xf32, #tpu.memory_space<vmem>>, vector<1x64xf32>,
    %c25 = arith.constant 25 : index
    %100 = memref.load %arg0[%c25] : memref<32xi32, #tpu.memory_space<smem>>
    %101 = arith.index_cast %100 : i32 to index
    %c0_75 = arith.constant 0 : index
    %102 = vector.load %arg2[%101, %c0_75] : memref<1000x64xf32, #tpu.memory_space<vmem>>, vector<1x64xf32>
    %c25_76 = arith.constant 25 : index
    %c0_77 = arith.constant 0 : index
    %103 = vector.load %arg7[%c25_76, %c0_77] : memref<32x64xf32, #tpu.memory_space<vmem>>, vector<1x64xf32>
    tpu.vector_store %arg7[%c25_76, %c0_77], %102 {strides = array<i32>} : memref<32x64xf32, #tpu.memory_space<vmem>>, vector<1x64xf32>,
    %c26 = arith.constant 26 : index
    %104 = memref.load %arg0[%c26] : memref<32xi32, #tpu.memory_space<smem>>
    %105 = arith.index_cast %104 : i32 to index
    %c0_78 = arith.constant 0 : index
    %106 = vector.load %arg2[%105, %c0_78] : memref<1000x64xf32, #tpu.memory_space<vmem>>, vector<1x64xf32>
    %c26_79 = arith.constant 26 : index
    %c0_80 = arith.constant 0 : index
    %107 = vector.load %arg7[%c26_79, %c0_80] : memref<32x64xf32, #tpu.memory_space<vmem>>, vector<1x64xf32>
    tpu.vector_store %arg7[%c26_79, %c0_80], %106 {strides = array<i32>} : memref<32x64xf32, #tpu.memory_space<vmem>>, vector<1x64xf32>,
    %c27 = arith.constant 27 : index
    %108 = memref.load %arg0[%c27] : memref<32xi32, #tpu.memory_space<smem>>
    %109 = arith.index_cast %108 : i32 to index
    %c0_81 = arith.constant 0 : index
    %110 = vector.load %arg2[%109, %c0_81] : memref<1000x64xf32, #tpu.memory_space<vmem>>, vector<1x64xf32>
    %c27_82 = arith.constant 27 : index
    %c0_83 = arith.constant 0 : index
    %111 = vector.load %arg7[%c27_82, %c0_83] : memref<32x64xf32, #tpu.memory_space<vmem>>, vector<1x64xf32>
    tpu.vector_store %arg7[%c27_82, %c0_83], %110 {strides = array<i32>} : memref<32x64xf32, #tpu.memory_space<vmem>>, vector<1x64xf32>,
    %c28 = arith.constant 28 : index
    %112 = memref.load %arg0[%c28] : memref<32xi32, #tpu.memory_space<smem>>
    %113 = arith.index_cast %112 : i32 to index
    %c0_84 = arith.constant 0 : index
    %114 = vector.load %arg2[%113, %c0_84] : memref<1000x64xf32, #tpu.memory_space<vmem>>, vector<1x64xf32>
    %c28_85 = arith.constant 28 : index
    %c0_86 = arith.constant 0 : index
    %115 = vector.load %arg7[%c28_85, %c0_86] : memref<32x64xf32, #tpu.memory_space<vmem>>, vector<1x64xf32>
    tpu.vector_store %arg7[%c28_85, %c0_86], %114 {strides = array<i32>} : memref<32x64xf32, #tpu.memory_space<vmem>>, vector<1x64xf32>,
    %c29 = arith.constant 29 : index
    %116 = memref.load %arg0[%c29] : memref<32xi32, #tpu.memory_space<smem>>
    %117 = arith.index_cast %116 : i32 to index
    %c0_87 = arith.constant 0 : index
    %118 = vector.load %arg2[%117, %c0_87] : memref<1000x64xf32, #tpu.memory_space<vmem>>, vector<1x64xf32>
    %c29_88 = arith.constant 29 : index
    %c0_89 = arith.constant 0 : index
    %119 = vector.load %arg7[%c29_88, %c0_89] : memref<32x64xf32, #tpu.memory_space<vmem>>, vector<1x64xf32>
    tpu.vector_store %arg7[%c29_88, %c0_89], %118 {strides = array<i32>} : memref<32x64xf32, #tpu.memory_space<vmem>>, vector<1x64xf32>,
    %c30 = arith.constant 30 : index
    %120 = memref.load %arg0[%c30] : memref<32xi32, #tpu.memory_space<smem>>
    %121 = arith.index_cast %120 : i32 to index
    %c0_90 = arith.constant 0 : index
    %122 = vector.load %arg2[%121, %c0_90] : memref<1000x64xf32, #tpu.memory_space<vmem>>, vector<1x64xf32>
    %c30_91 = arith.constant 30 : index
    %c0_92 = arith.constant 0 : index
    %123 = vector.load %arg7[%c30_91, %c0_92] : memref<32x64xf32, #tpu.memory_space<vmem>>, vector<1x64xf32>
    tpu.vector_store %arg7[%c30_91, %c0_92], %122 {strides = array<i32>} : memref<32x64xf32, #tpu.memory_space<vmem>>, vector<1x64xf32>,
    %c31 = arith.constant 31 : index
    %124 = memref.load %arg0[%c31] : memref<32xi32, #tpu.memory_space<smem>>
    %125 = arith.index_cast %124 : i32 to index
    %c0_93 = arith.constant 0 : index
    %126 = vector.load %arg2[%125, %c0_93] : memref<1000x64xf32, #tpu.memory_space<vmem>>, vector<1x64xf32>
    %c31_94 = arith.constant 31 : index
    %c0_95 = arith.constant 0 : index
    %127 = vector.load %arg7[%c31_94, %c0_95] : memref<32x64xf32, #tpu.memory_space<vmem>>, vector<1x64xf32>
    tpu.vector_store %arg7[%c31_94, %c0_95], %126 {strides = array<i32>} : memref<32x64xf32, #tpu.memory_space<vmem>>, vector<1x64xf32>,
    %c0_96 = arith.constant 0 : index
    %c0_97 = arith.constant 0 : index
    %128 = vector.load %arg7[%c0_96, %c0_97] : memref<32x64xf32, #tpu.memory_space<vmem>>, vector<32x64xf32>
    %c0_98 = arith.constant 0 : index
    %c0_99 = arith.constant 0 : index
    %129 = vector.load %arg1[%c0_98, %c0_99] : memref<32x10xf32, #tpu.memory_space<vmem>>, vector<32x10xf32>
    %c0_100 = arith.constant 0 : index
    %c0_101 = arith.constant 0 : index
    %130 = vector.load %arg3[%c0_100, %c0_101] : memref<11x20xf32, #tpu.memory_space<vmem>>, vector<10x20xf32>
    %c10_102 = arith.constant 10 : index
    %c0_103 = arith.constant 0 : index
    %131 = vector.load %arg3[%c10_102, %c0_103] : memref<11x20xf32, #tpu.memory_space<vmem>>, vector<1x20xf32>
    %cst = arith.constant dense<0.000000e+00> : vector<32x20xf32>
    %132 = tpu.matmul %129, %130, %cst {dimension_numbers = #tpu.dot_dimension_numbers<[1], [0], [0], [1], [0, 0, 1, 1], [], []>} : vector<32x10xf32>, vector<10x20xf32>, vector<32x20xf32> -> vector<32x20xf32>
    %133 = vector.broadcast %131 : vector<1x20xf32> to vector<32x20xf32>
    %134 = arith.addf %132, %133 : vector<32x20xf32>
    %cst_104 = arith.constant 0.000000e+00 : f32
    %135 = vector.broadcast %cst_104 : f32 to vector<32x20xf32>
    %136 = arith.maximumf %134, %135 : vector<32x20xf32>
    %c0_105 = arith.constant 0 : index
    %c0_106 = arith.constant 0 : index
    %c0_107 = arith.constant 0 : index
    %137 = vector.load %arg4[%c0_105, %c0_106, %c0_107] : memref<3x21x64xf32, #tpu.memory_space<vmem>>, vector<1x20x64xf32>
    %138 = vector.shape_cast %137 : vector<1x20x64xf32> to vector<20x64xf32>
    %c0_108 = arith.constant 0 : index
    %c20_109 = arith.constant 20 : index
    %c0_110 = arith.constant 0 : index
    %139 = vector.load %arg4[%c0_108, %c20_109, %c0_110] : memref<3x21x64xf32, #tpu.memory_space<vmem>>, vector<1x1x64xf32>
    %140 = vector.shape_cast %139 : vector<1x1x64xf32> to vector<1x64xf32>
    %cst_111 = arith.constant dense<0.000000e+00> : vector<32x64xf32>
    %141 = tpu.matmul %136, %138, %cst_111 {dimension_numbers = #tpu.dot_dimension_numbers<[1], [0], [0], [1], [0, 0, 1, 1], [], []>} : vector<32x20xf32>, vector<20x64xf32>, vector<32x64xf32> -> vector<32x64xf32>
    %142 = vector.broadcast %140 : vector<1x64xf32> to vector<32x64xf32>
    %143 = arith.addf %141, %142 : vector<32x64xf32>
    %144 = arith.mulf %143, %128 : vector<32x64xf32>
    %cst_112 = arith.constant dense<0.000000e+00> : vector<32xf32>
    %145 = vector.multi_reduction <add>, %144, %cst_112 [1] : vector<32x64xf32> to vector<32xf32>
    %146 = vector.shape_cast %145 : vector<32xf32> to vector<32x1xf32>
    %c1_113 = arith.constant 1 : index
    %c0_114 = arith.constant 0 : index
    %c0_115 = arith.constant 0 : index
    %147 = vector.load %arg4[%c1_113, %c0_114, %c0_115] : memref<3x21x64xf32, #tpu.memory_space<vmem>>, vector<1x20x64xf32>
    %148 = vector.shape_cast %147 : vector<1x20x64xf32> to vector<20x64xf32>
    %c1_116 = arith.constant 1 : index
    %c20_117 = arith.constant 20 : index
    %c0_118 = arith.constant 0 : index
    %149 = vector.load %arg4[%c1_116, %c20_117, %c0_118] : memref<3x21x64xf32, #tpu.memory_space<vmem>>, vector<1x1x64xf32>
    %150 = vector.shape_cast %149 : vector<1x1x64xf32> to vector<1x64xf32>
    %cst_119 = arith.constant dense<0.000000e+00> : vector<32x64xf32>
    %151 = tpu.matmul %136, %148, %cst_119 {dimension_numbers = #tpu.dot_dimension_numbers<[1], [0], [0], [1], [0, 0, 1, 1], [], []>} : vector<32x20xf32>, vector<20x64xf32>, vector<32x64xf32> -> vector<32x64xf32>
    %152 = vector.broadcast %150 : vector<1x64xf32> to vector<32x64xf32>
    %153 = arith.addf %151, %152 : vector<32x64xf32>
    %154 = arith.mulf %153, %128 : vector<32x64xf32>
    %cst_120 = arith.constant dense<0.000000e+00> : vector<32xf32>
    %155 = vector.multi_reduction <add>, %154, %cst_120 [1] : vector<32x64xf32> to vector<32xf32>
    %156 = vector.shape_cast %155 : vector<32xf32> to vector<32x1xf32>
    %c2_121 = arith.constant 2 : index
    %c0_122 = arith.constant 0 : index
    %c0_123 = arith.constant 0 : index
    %157 = vector.load %arg4[%c2_121, %c0_122, %c0_123] : memref<3x21x64xf32, #tpu.memory_space<vmem>>, vector<1x20x64xf32>
    %158 = vector.shape_cast %157 : vector<1x20x64xf32> to vector<20x64xf32>
    %c2_124 = arith.constant 2 : index
    %c20_125 = arith.constant 20 : index
    %c0_126 = arith.constant 0 : index
    %159 = vector.load %arg4[%c2_124, %c20_125, %c0_126] : memref<3x21x64xf32, #tpu.memory_space<vmem>>, vector<1x1x64xf32>
    %160 = vector.shape_cast %159 : vector<1x1x64xf32> to vector<1x64xf32>
    %cst_127 = arith.constant dense<0.000000e+00> : vector<32x64xf32>
    %161 = tpu.matmul %136, %158, %cst_127 {dimension_numbers = #tpu.dot_dimension_numbers<[1], [0], [0], [1], [0, 0, 1, 1], [], []>} : vector<32x20xf32>, vector<20x64xf32>, vector<32x64xf32> -> vector<32x64xf32>
    %162 = vector.broadcast %160 : vector<1x64xf32> to vector<32x64xf32>
    %163 = arith.addf %161, %162 : vector<32x64xf32>
    %164 = arith.mulf %163, %128 : vector<32x64xf32>
    %cst_128 = arith.constant dense<0.000000e+00> : vector<32xf32>
    %165 = vector.multi_reduction <add>, %164, %cst_128 [1] : vector<32x64xf32> to vector<32xf32>
    %166 = vector.shape_cast %165 : vector<32xf32> to vector<32x1xf32>
    %167 = arith.maximumf %146, %156 : vector<32x1xf32>
    %168 = arith.maximumf %167, %166 : vector<32x1xf32>
    %169 = arith.subf %146, %168 : vector<32x1xf32>
    %170 = math.exp %169 : vector<32x1xf32>
    %171 = arith.subf %156, %168 : vector<32x1xf32>
    %172 = math.exp %171 : vector<32x1xf32>
    %173 = arith.subf %166, %168 : vector<32x1xf32>
    %174 = math.exp %173 : vector<32x1xf32>
    %175 = arith.addf %170, %172 : vector<32x1xf32>
    %176 = arith.addf %175, %174 : vector<32x1xf32>
    %177 = tpu.reciprocal %176 {approx = true} : vector<32x1xf32> -> vector<32x1xf32>
    %178 = vector.broadcast %170 : vector<32x1xf32> to vector<32x64xf32>
    %179 = arith.mulf %178, %143 : vector<32x64xf32>
    %180 = vector.broadcast %172 : vector<32x1xf32> to vector<32x64xf32>
    %181 = arith.mulf %180, %153 : vector<32x64xf32>
    %182 = vector.broadcast %174 : vector<32x1xf32> to vector<32x64xf32>
    %183 = arith.mulf %182, %163 : vector<32x64xf32>
    %184 = arith.addf %179, %181 : vector<32x64xf32>
    %185 = arith.addf %184, %183 : vector<32x64xf32>
    %186 = vector.broadcast %177 : vector<32x1xf32> to vector<32x64xf32>
    %187 = arith.mulf %185, %186 : vector<32x64xf32>
    %188 = tpu.concatenate %187, %128 in 1 : vector<32x64xf32>, vector<32x64xf32> -> vector<32x128xf32>
    %c0_129 = arith.constant 0 : index
    %c0_130 = arith.constant 0 : index
    %189 = vector.load %arg5[%c0_129, %c0_130] : memref<132x4xf32, #tpu.memory_space<vmem>>, vector<128x4xf32>
    %cst_131 = arith.constant dense<0.000000e+00> : vector<32x4xf32>
    %190 = tpu.matmul %188, %189, %cst_131 {dimension_numbers = #tpu.dot_dimension_numbers<[1], [0], [0], [1], [0, 0, 1, 1], [], []>} : vector<32x128xf32>, vector<128x4xf32>, vector<32x4xf32> -> vector<32x4xf32>
    %c128 = arith.constant 128 : index
    %c0_132 = arith.constant 0 : index
    %191 = vector.load %arg5[%c128, %c0_132] : memref<132x4xf32, #tpu.memory_space<vmem>>, vector<1x4xf32>
    %192 = vector.broadcast %146 : vector<32x1xf32> to vector<32x4xf32>
    %193 = vector.broadcast %191 : vector<1x4xf32> to vector<32x4xf32>
    %194 = arith.mulf %192, %193 : vector<32x4xf32>
    %195 = arith.addf %190, %194 : vector<32x4xf32>
    %c129 = arith.constant 129 : index
    %c0_133 = arith.constant 0 : index
    %196 = vector.load %arg5[%c129, %c0_133] : memref<132x4xf32, #tpu.memory_space<vmem>>, vector<1x4xf32>
    %197 = vector.broadcast %156 : vector<32x1xf32> to vector<32x4xf32>
    %198 = vector.broadcast %196 : vector<1x4xf32> to vector<32x4xf32>
    %199 = arith.mulf %197, %198 : vector<32x4xf32>
    %200 = arith.addf %195, %199 : vector<32x4xf32>
    %c130 = arith.constant 130 : index
    %c0_134 = arith.constant 0 : index
    %201 = vector.load %arg5[%c130, %c0_134] : memref<132x4xf32, #tpu.memory_space<vmem>>, vector<1x4xf32>
    %202 = vector.broadcast %166 : vector<32x1xf32> to vector<32x4xf32>
    %203 = vector.broadcast %201 : vector<1x4xf32> to vector<32x4xf32>
    %204 = arith.mulf %202, %203 : vector<32x4xf32>
    %205 = arith.addf %200, %204 : vector<32x4xf32>
    %c131 = arith.constant 131 : index
    %c0_135 = arith.constant 0 : index
    %206 = vector.load %arg5[%c131, %c0_135] : memref<132x4xf32, #tpu.memory_space<vmem>>, vector<1x4xf32>
    %207 = vector.broadcast %206 : vector<1x4xf32> to vector<32x4xf32>
    %208 = arith.addf %205, %207 : vector<32x4xf32>
    %c0_136 = arith.constant 0 : index
    %c0_137 = arith.constant 0 : index
    %209 = vector.load %arg6[%c0_136, %c0_137] : memref<32x4xf32, #tpu.memory_space<vmem>>, vector<32x4xf32>
    tpu.vector_store %arg6[%c0_136, %c0_137], %208 {strides = array<i32>} : memref<32x4xf32, #tpu.memory_space<vmem>>, vector<32x4xf32>,
    return
  }
}

</mosaic_0001>

<bundles_post_ra>
// kernel: tpu_custom_call.1
= control target key start
LH: loop header
LB: loop body
LE: loop exit
PB: predicated region body
PF: predicated region fallthrough
CT: control target
= control target key end

     0   :  { %11 = vsyncpa [#allocation4], 0  ;;  %s1716_s0 = inlined_call_operand.vmem [shape: s32[32], index: 0, kind: input, shape index: {}]   ;;  %s1717_s1 = inlined_call_operand.vmem [shape: f32[32,10], index: 1, kind: input, shape index: {}]   ;;  %s1718_s2 = inlined_call_operand.vmem [shape: f32[1000,64], index: 2, kind: input, shape index: {}]   ;;  %s1719_s3 = inlined_call_operand.vmem [shape: f32[11,20], index: 3, kind: input, shape index: {}]   ;;  %s1720_s4 = inlined_call_operand.vmem [shape: f32[3,21,64], index: 4, kind: input, shape index: {}]   ;;  %s1721_s5 = inlined_call_operand.vmem [shape: f32[132,4], index: 5, kind: input, shape index: {}]   ;;  %s1722_s6 = inlined_call_operand.vmem [shape: f32[32,4], index: 6, kind: output, shape index: {}]  }
   0x1   :  { %s18_s23 = sshll.u32 %s1716_s0, 4  ;;  %s19_s23 = int_to_ptr.vmem [resolvable:$true] %s18_s23 }
   0x2   :  { %s1219_s24 = scalar_lea.vmem %s19_s23, 16  ;;  %p1224_p1 = scmp.lt.s32.totalorder %s19_s23, %s19_s23 }
   0x3   :  { %p1220_p0 = scmp.ne.s32.totalorder %s19_s23, %s1219_s24  ;;  %p1225_p2 = scmp.lt.s32.totalorder %s1219_s24, %s1219_s24 }
   0x5   :  { %p1226_p3 = por %p1225_p2, %p1224_p1 }
   0x7   :  { %p1227_p4 = pnand %p1226_p3, %p1220_p0 }
   0x9   :  { %1230 = shalt.err (!%p1227_p4)
}
   0xa   :  { %s1233_s25 = smov [#allocation3]  }
   0xb   :  { %21 = dma.vmem_to_smem %s19_s23, 16, %s1233_s25, [#allocation4]  }
   0xc   :  { %1231 = dma.done.wait [#allocation4], 16  }
   0xd   :  { %1232 = vsyncadd [#allocation4], 4294967280 }
   0xe   :  { %35 = sfence }
   0xf   :  { %v173_v0 = vld [vmem:[%s1719_s3] sm:$0xff]  ;;  %v174_v1 = vld [vmem:[%s1719_s3 + $0x8] sm:$0x3]  ;;  %vm193_vm0 = vcmask 1041408   ;;  %vm1234_vm1 = vmmov 1   ;;  %vm180_vm3 = vcmask 80896  }
  0x10   :  { %v169_v2 = vld [vmem:[%s1717_s1] sm:$0xff]  ;;  %v1124_v3 = vpack.c.bf16 %v174_v1, %v173_v0  ;;  %vm1125_vm2 = vmpackc.low %vm193_vm0, %vm1234_vm1  ;;  %v287_v5 = vld [vmem:[%s1720_s4 + $0x8] sm:$0xff]  ;;  %vm307_vm4 = vcmask 1043456   ;;  %vm294_vm5 = vcmask 162816   ;;  %s933_s30 = sld [smem:[#allocation3 + $0x8]]  ;;  %s934_s7 = sld [smem:[#allocation3 + $0x9]] }
  0x11   :  { %1044 = vmatprep.mubr.msk.f32.mxu1 %vm180_vm3, %v169_v2  ;;  %v286_v4 = vld [vmem:[%s1720_s4] sm:$0xff]  ;;  %v170_v7 = vld [vmem:[%s1717_s1 + $0x8] sm:$0xff]  ;;  %v171_v8 = vld [vmem:[%s1717_s1 + $0x10] sm:$0xff]  ;;  %s935_s8 = sld [smem:[#allocation3 + $0xa]]  ;;  %s936_s9 = sld [smem:[#allocation3 + $0xb]]  ;;  %vm39_vm6 = vcmask 516096  }
  0x12   :  { %1126 = vmatprep.subr.msk.bf16.mxu1 %vm1125_vm2, %v1124_v3  ;;  %v1130_v6 = vpack.c.bf16 %v287_v5, %v286_v4  ;;  %v172_v9 = vld [vmem:[%s1717_s1 + $0x18] sm:$0xff]  ;;  %v288_v10 = vld [vmem:[%s1720_s4 + $0x10] sm:$0xf]  ;;  %v970_v12 = vld [vmem:[%s1720_s4 + $0x20] sm:$0xff]  ;;  %s937_s10 = sld [smem:[#allocation3 + $0xc]]  ;;  %s938_s11 = sld [smem:[#allocation3 + $0xd]] }
  0x13   :  { %1129 = vmatpush3.bf16.msk.msra.mxu1 %vm1125_vm2, %v1124_v3  ;;  %v969_v11 = vld [vmem:[%s1720_s4 + $0x18] sm:$0xff]  ;;  %v957_v14 = vld [vmem:[%s1719_s3 + $0xa] ss:$0 sm:$0xff]  ;;  %v979_v26 = vld [vmem:[%s1720_s4 + $0x30] sm:$0xff]  ;;  %s939_s12 = sld [smem:[#allocation3 + $0xe]]  ;;  %s940_s13 = sld [smem:[#allocation3 + $0xf]] }
  0x14   :  { %1131 = vmatprep.subr.bf16.mxu1 %v1130_v6  ;;  %v1134_v13 = vpack.c.bf16 %v970_v12, %v969_v11  ;;  %v971_v25 = vld [vmem:[%s1720_s4 + $0x28] sm:$0xf]  ;;  %v980_v27 = vld [vmem:[%s1720_s4 + $0x38] sm:$0xff]  ;;  %v981_v31 = vld [vmem:[%s1720_s4 + $0x40] sm:$0xf]  ;;  %s1340_s14 = sld [smem:[#allocation3]] }
  0x15   :  { %v1138_v30 = vpack.c.bf16 %v980_v27, %v979_v26  ;;  %s1342_s15 = sld [smem:[#allocation3 + $0x1]]  ;;  %s1344_s16 = sld [smem:[#allocation3 + $0x2]]  ;;  %v963_v0 = vld [vmem:[%s1720_s4 + $0x14] ss:$0 sm:$0xff]  ;;  %vm400_vm7 = vcmask 523264   ;;  %vm884_vm8 = vcmask 31744  }
  0x16   :  { %1045 = vmatmul.mubr.msk.f32.vlgmr.msra.gmra.mrb[0].mxu1 %vm180_vm3, %v170_v7  ;;  %s1346_s17 = sld [smem:[#allocation3 + $0x3]]  ;;  %s70_s20 = scalar_lea.vmem %s1718_s2, %s933_s30 }
  0x17   :  { %1047 = vmatprep.mubr.msk.f32.mxu1 %vm180_vm3, %v171_v8  ;;  %1133 = vmatpush3.bf16.msra.mxu1 %v1130_v6  ;;  %s74_s1 = scalar_lea.vmem %s1718_s2, %s934_s7  ;;  %v71_v32 = vld [vmem:[%s70_s20] sm:$0x1]  ;;  %s78_s25 = scalar_lea.vmem %s1718_s2, %s935_s8 }
  0x18   :  { %1054 = vmatprep.subr.msk.mxu1 %vm307_vm4, %v288_v10  ;;  %v75_v33 = vld [vmem:[%s74_s1] sm:$0x1]  ;;  %s82_s3 = scalar_lea.vmem %s1718_s2, %s936_s9  ;;  %72 = vst.msk [vmem:[#allocation2 + $0x8] sm:$0x1] %vm39_vm6, %v71_v32  ;;  %s86_s0 = scalar_lea.vmem %s1718_s2, %s937_s10  ;;  %v983_v32 = vld [vmem:[%s1720_s4 + $0x44] ss:$0 sm:$0xff] }
  0x19   :  { %76 = vst.msk [vmem:[#allocation2 + $0x9] sm:$0x1] %vm39_vm6, %v75_v33  ;;  %v79_v34 = vld [vmem:[%s78_s25] sm:$0x1]  ;;  %s90_s8 = scalar_lea.vmem %s1718_s2, %s938_s11  ;;  %s94_s19 = scalar_lea.vmem %s1718_s2, %s939_s12 }
  0x1a   :  { %1048 = vmatmul.mubr.msk.f32.gmra.mrb[2].mxu1 %vm180_vm3, %v172_v9  ;;  %v83_v35 = vld [vmem:[%s82_s3] sm:$0x1]  ;;  %80 = vst.msk [vmem:[#allocation2 + $0xa] sm:$0x1] %vm39_vm6, %v79_v34  ;;  %s98_s10 = scalar_lea.vmem %s1718_s2, %s940_s13  ;;  %s37_s1 = scalar_lea.vmem %s1718_s2, %s1340_s14 }
  0x1b   :  { %1055 = vmatpush3.msk.msra.mxu1 %vm307_vm4, %v288_v10  ;;  %84 = vst.msk [vmem:[#allocation2 + $0xb] sm:$0x1] %vm39_vm6, %v83_v35  ;;  %v87_v36 = vld [vmem:[%s86_s0] sm:$0x1]  ;;  %s42_s25 = scalar_lea.vmem %s1718_s2, %s1342_s15  ;;  %s46_s26 = scalar_lea.vmem %s1718_s2, %s1344_s16 }
  0x1c   :  { %1135 = vmatprep.subr.bf16.mxu1 %v1134_v13  ;;  %v91_v37 = vld [vmem:[%s90_s8] sm:$0x1]  ;;  %88 = vst.msk [vmem:[#allocation2 + $0xc] sm:$0x1] %vm39_vm6, %v87_v36  ;;  %s50_s28 = scalar_lea.vmem %s1718_s2, %s1346_s17  ;;  %s929_s14 = sld [smem:[#allocation3 + $0x4]] }
  0x1d   :  { %92 = vst.msk [vmem:[#allocation2 + $0xd] sm:$0x1] %vm39_vm6, %v91_v37  ;;  %v95_v38 = vld [vmem:[%s94_s19] sm:$0x1]  ;;  %s930_s15 = sld [smem:[#allocation3 + $0x5]]  ;;  %s931_s29 = sld [smem:[#allocation3 + $0x6]] }
  0x1e   :  { %v99_v39 = vld [vmem:[%s98_s10] sm:$0x1]  ;;  %96 = vst.msk [vmem:[#allocation2 + $0xe] sm:$0x1] %vm39_vm6, %v95_v38  ;;  %s932_s0 = sld [smem:[#allocation3 + $0x7]]  ;;  %s949_s30 = sld [smem:[#allocation3 + $0x18]] }
  0x1f   :  { %100 = vst.msk [vmem:[#allocation2 + $0xf] sm:$0x1] %vm39_vm6, %v99_v39  ;;  %v38_v40 = vld [vmem:[%s37_s1] sm:$0x1]  ;;  %s950_s16 = sld [smem:[#allocation3 + $0x19]]  ;;  %s951_s7 = sld [smem:[#allocation3 + $0x1a]] }
  0x20   :  { %v43_v41 = vld [vmem:[%s42_s25] sm:$0x1]  ;;  %40 = vst.msk [vmem:[#allocation2] sm:$0x1] %vm39_vm6, %v38_v40  ;;  %s952_s8 = sld [smem:[#allocation3 + $0x1b]]  ;;  %s953_s9 = sld [smem:[#allocation3 + $0x1c]] }
  0x21   :  { %44 = vst.msk [vmem:[#allocation2 + $0x1] sm:$0x1] %vm39_vm6, %v43_v41  ;;  %v47_v42 = vld [vmem:[%s46_s26] sm:$0x1]  ;;  %s1400_s17 = sld [smem:[#allocation3 + $0x1d]]  ;;  %s1402_s18 = sld [smem:[#allocation3 + $0x1e]] }
  0x22   :  { %v51_v43 = vld [vmem:[%s50_s28] sm:$0x1]  ;;  %48 = vst.msk [vmem:[#allocation2 + $0x2] sm:$0x1] %vm39_vm6, %v47_v42  ;;  %s54_s21 = scalar_lea.vmem %s1718_s2, %s929_s14  ;;  %s1407_s10 = sld [smem:[#allocation3 + $0x1f]] }
  0x23   :  { %52 = vst.msk [vmem:[#allocation2 + $0x3] sm:$0x1] %vm39_vm6, %v51_v43  ;;  %v55_v44 = vld [vmem:[%s54_s21] sm:$0x1]  ;;  %s58_s1 = scalar_lea.vmem %s1718_s2, %s930_s15  ;;  %s62_s25 = scalar_lea.vmem %s1718_s2, %s931_s29 }
  0x24   :  { %56 = vst.msk [vmem:[#allocation2 + $0x4] sm:$0x1] %vm39_vm6, %v55_v44  ;;  %v59_v45 = vld [vmem:[%s58_s1] sm:$0x1]  ;;  %s66_s26 = scalar_lea.vmem %s1718_s2, %s932_s0  ;;  %s134_s28 = scalar_lea.vmem %s1718_s2, %s949_s30 }
  0x25   :  { %v63_v46 = vld [vmem:[%s62_s25] sm:$0x1]  ;;  %60 = vst.msk [vmem:[#allocation2 + $0x5] sm:$0x1] %vm39_vm6, %v59_v45  ;;  %s138_s29 = scalar_lea.vmem %s1718_s2, %s950_s16  ;;  %s142_s0 = scalar_lea.vmem %s1718_s2, %s951_s7 }
  0x26   :  { %64 = vst.msk [vmem:[#allocation2 + $0x6] sm:$0x1] %vm39_vm6, %v63_v46  ;;  %v67_v47 = vld [vmem:[%s66_s26] sm:$0x1]  ;;  %s146_s11 = scalar_lea.vmem %s1718_s2, %s952_s8  ;;  %s150_s23 = scalar_lea.vmem %s1718_s2, %s953_s9  ;;  %v1492_v2 = vld [vmem:[#allocation2 + $0x8] sm:$0xff] }
  0x27   :  { %v135_v48 = vld [vmem:[%s134_s28] sm:$0x1]  ;;  %68 = vst.msk [vmem:[#allocation2 + $0x7] sm:$0x1] %vm39_vm6, %v67_v47  ;;  %s154_s24 = scalar_lea.vmem %s1718_s2, %s1400_s17  ;;  %s158_s13 = scalar_lea.vmem %s1718_s2, %s1402_s18 }
  0x28   :  { %136 = vst.msk [vmem:[#allocation2 + $0x18] sm:$0x1] %vm39_vm6, %v135_v48  ;;  %v139_v49 = vld [vmem:[%s138_s29] sm:$0x1]  ;;  %s162_s26 = scalar_lea.vmem %s1718_s2, %s1407_s10  ;;  %s941_s27 = sld [smem:[#allocation3 + $0x10]] }
  0x29   :  { %v143_v50 = vld [vmem:[%s142_s0] sm:$0x1]  ;;  %140 = vst.msk [vmem:[#allocation2 + $0x19] sm:$0x1] %vm39_vm6, %v139_v49  ;;  %s942_s17 = sld [smem:[#allocation3 + $0x11]]  ;;  %s943_s3 = sld [smem:[#allocation3 + $0x12]] }
  0x2a   :  { %144 = vst.msk [vmem:[#allocation2 + $0x1a] sm:$0x1] %vm39_vm6, %v143_v50  ;;  %v147_v51 = vld [vmem:[%s146_s11] sm:$0x1]  ;;  %s944_s18 = sld [smem:[#allocation3 + $0x13]]  ;;  %s945_s28 = sld [smem:[#allocation3 + $0x14]] }
  0x2b   :  { %v151_v52 = vld [vmem:[%s150_s23] sm:$0x1]  ;;  %148 = vst.msk [vmem:[#allocation2 + $0x1b] sm:$0x1] %vm39_vm6, %v147_v51  ;;  %s946_s14 = sld [smem:[#allocation3 + $0x15]]  ;;  %s947_s15 = sld [smem:[#allocation3 + $0x16]] }
  0x2c   :  { %152 = vst.msk [vmem:[#allocation2 + $0x1c] sm:$0x1] %vm39_vm6, %v151_v52  ;;  %v155_v53 = vld [vmem:[%s154_s24] sm:$0x1]  ;;  %s948_s29 = sld [smem:[#allocation3 + $0x17]] }
  0x2d   :  { %v159_v54 = vld [vmem:[%s158_s13] sm:$0x1]  ;;  %156 = vst.msk [vmem:[#allocation2 + $0x1d] sm:$0x1] %vm39_vm6, %v155_v53 }
  0x2e   :  { %160 = vst.msk [vmem:[#allocation2 + $0x1e] sm:$0x1] %vm39_vm6, %v159_v54  ;;  %v163_v55 = vld [vmem:[%s162_s26] sm:$0x1]  ;;  %s102_s0 = scalar_lea.vmem %s1718_s2, %s941_s27 }
  0x2f   :  { %164 = vst.msk [vmem:[#allocation2 + $0x1f] sm:$0x1] %vm39_vm6, %v163_v55  ;;  %v103_v56 = vld [vmem:[%s102_s0] sm:$0x1]  ;;  %s106_s21 = scalar_lea.vmem %s1718_s2, %s942_s17  ;;  %s110_s1 = scalar_lea.vmem %s1718_s2, %s943_s3 }
  0x30   :  { %104 = vst.msk [vmem:[#allocation2 + $0x10] sm:$0x1] %vm39_vm6, %v103_v56  ;;  %v107_v57 = vld [vmem:[%s106_s21] sm:$0x1]  ;;  %s114_s7 = scalar_lea.vmem %s1718_s2, %s944_s18  ;;  %s118_s12 = scalar_lea.vmem %s1718_s2, %s945_s28 }
  0x31   :  { %v111_v58 = vld [vmem:[%s110_s1] sm:$0x1]  ;;  %108 = vst.msk [vmem:[#allocation2 + $0x11] sm:$0x1] %vm39_vm6, %v107_v57  ;;  %s122_s9 = scalar_lea.vmem %s1718_s2, %s946_s14  ;;  %s126_s17 = scalar_lea.vmem %s1718_s2, %s947_s15  ;;  %v740_v57 = vld [vmem:[%s1721_s5 + $0x8] sm:$0xff] }
  0x32   :  { %112 = vst.msk [vmem:[#allocation2 + $0x12] sm:$0x1] %vm39_vm6, %v111_v58  ;;  %v115_v59 = vld [vmem:[%s114_s7] sm:$0x1]  ;;  %s130_s28 = scalar_lea.vmem %s1718_s2, %s948_s29  ;;  %s1235_s21 = smov 64  }
  0x33   :  { %v119_v60 = vld [vmem:[%s118_s12] sm:$0x1]  ;;  %116 = vst.msk [vmem:[#allocation2 + $0x13] sm:$0x1] %vm39_vm6, %v115_v59 }
  0x34   :  { %120 = vst.msk [vmem:[#allocation2 + $0x14] sm:$0x1] %vm39_vm6, %v119_v60  ;;  %v123_v61 = vld [vmem:[%s122_s9] sm:$0x1]  ;;  %v741_v60 = vld [vmem:[%s1721_s5 + $0x10] sm:$0xff] }
  0x35   :  { %v127_v62 = vld [vmem:[%s126_s17] sm:$0x1]  ;;  %124 = vst.msk [vmem:[#allocation2 + $0x15] sm:$0x1] %vm39_vm6, %v123_v61  ;;  %v742_v61 = vld [vmem:[%s1721_s5 + $0x18] sm:$0xff] }
  0x36   :  { %128 = vst.msk [vmem:[#allocation2 + $0x16] sm:$0x1] %vm39_vm6, %v127_v62  ;;  %v131_v63 = vld [vmem:[%s130_s28] sm:$0x1]  ;;  %v1504_v10 = vld [vmem:[#allocation2 + $0x18] sm:$0xff]  ;;  %v1146_v62 = vpack.c.bf16 %v742_v61, %v741_v60 }
  0x37   :  { %132 = vst.msk [vmem:[#allocation2 + $0x17] sm:$0x1] %vm39_vm6, %v131_v63  ;;  %v1496_v5 = vld [vmem:[#allocation2] sm:$0xff] }
  0x38   :  { %v739_v56 = vld [vmem:[%s1721_s5] sm:$0xff]  ;;  %v1177_v58 = vpack.i.bf16 %v1492_v2, %v1496_v5 }
  0x39   :  { %v1142_v59 = vpack.c.bf16 %v740_v57, %v739_v56  ;;  %v743_v63 = vld [vmem:[%s1721_s5 + $0x20] sm:$0xff] }
  0x3b   :  { %1143 = vmatprep.subr.bf16.mxu0 %v1142_v59 }
  0x3c   :  { %1145 = vmatpush3.bf16.msra.mxu0 %v1142_v59 }
  0x3d   :  { %1147 = vmatprep.subr.bf16.mxu0 %v1146_v62 }
  0x40   :  { %1149 = vmatpush3.bf16.msra.mxu0 %v1146_v62 }
  0xe9   :  { %v1046_v15 = vpop.f32.mrb[0].mxu1 }
  0xea   :  { %v269_v16 = vadd.f32 %v1046_v15, %v957_v14  ;;  %v263_v17 = vpop.f32.mrb[1].mxu1 }
  0xeb   :  { %v264_v18 = vadd.f32 %v957_v14, %v263_v17 }
  0xec   :  { %v283_v21 = vmax.f32 %v269_v16, 0.0  ;;  %v973_v16 = vld [vmem:[%s1720_s4 + $0x2c] ss:$0 sm:$0xff] }
  0xed   :  { %v282_v19 = vmax.f32 %v264_v18, 0.0  ;;  %v1049_v20 = vpop.f32.mrb[2].mxu1  ;;  %v167_v18 = vld [vmem:[#allocation2 + $0x10] sm:$0xff] }
  0xee   :  { %v279_v22 = vadd.f32 %v1049_v20, %v957_v14  ;;  %v273_v23 = vpop.f32.mrb[3].mxu1  ;;  %v1182_v55 = vpack.i.bf16 %v1504_v10, %v167_v18 }
  0xef   :  { %v274_v24 = vadd.f32 %v957_v14, %v273_v23  ;;  %1056 = vmatprep.mubr.msk.f32.mxu1 %vm294_vm5, %v282_v19 }
  0xf0   :  { %1057 = vmatmul.mubr.msk.f32.vlgmr.msra.gmra.mrb[4].mxu1 %vm294_vm5, %v283_v21  ;;  %v285_v29 = vmax.f32 %v279_v22, 0.0 }
  0xf1   :  { %v284_v28 = vmax.f32 %v274_v24, 0.0  ;;  %1137 = vmatpush3.bf16.msra.mxu1 %v1134_v13 }
  0xf2   :  { %1066 = vmatprep.subr.msk.mxu1 %vm307_vm4, %v971_v25 }
  0xf3   :  { %1059 = vmatprep.mubr.msk.f32.mxu1 %vm294_vm5, %v284_v28 }
  0xf4   :  { %1060 = vmatmul.mubr.msk.f32.gmra.mrb[6].mxu1 %vm294_vm5, %v285_v29 }
  0xf5   :  { %1067 = vmatpush3.msk.msra.mxu1 %vm307_vm4, %v971_v25  ;;  %1068 = vmatprep.mubr.msk.f32.mxu1 %vm294_vm5, %v282_v19 }
  0xf6   :  { %1139 = vmatprep.subr.bf16.mxu1 %v1138_v30 }
  0xf8   :  { %1069 = vmatmul.mubr.msk.f32.vlgmr.msra.gmra.mrb[8].mxu1 %vm294_vm5, %v283_v21 }
  0xf9   :  { %1071 = vmatprep.mubr.msk.f32.mxu1 %vm294_vm5, %v284_v28  ;;  %1141 = vmatpush3.bf16.msra.mxu1 %v1138_v30 }
  0xfa   :  { %1078 = vmatprep.subr.msk.mxu1 %vm307_vm4, %v981_v31 }
  0xfc   :  { %1072 = vmatmul.mubr.msk.f32.gmra.mrb[10].mxu1 %vm294_vm5, %v285_v29 }
  0xfd   :  { %1080 = vmatprep.mubr.msk.f32.mxu1 %vm294_vm5, %v282_v19  ;;  %1079 = vmatpush3.msk.msra.mxu1 %vm307_vm4, %v981_v31 }
 0x100   :  { %1081 = vmatmul.mubr.msk.f32.vlgmr.msra.gmra.mrb[12].mxu1 %vm294_vm5, %v283_v21 }
 0x101   :  { %1083 = vmatprep.mubr.msk.f32.mxu1 %vm294_vm5, %v284_v28 }
 0x104   :  { %1084 = vmatmul.mubr.msk.f32.gmra.mrb[14].mxu1 %vm294_vm5, %v285_v29 }
 0x1c3   :  { %v1058_v1 = vpop.f32.mrb[4].mxu1 }
 0x1c4   :  { %v1494_v3 = vadd.f32 %v1058_v1, %v963_v0  ;;  %v377_v4 = vpop.f32.mrb[5].mxu1 }
 0x1c5   :  { %v1498_v6 = vadd.f32 %v963_v0, %v377_v4  ;;  %v746_v4 = vld [vmem:[%s1721_s5 + $0x38] sm:$0xff] }
 0x1c6   :  { %v397_v7 = vmul.f32 %v1494_v3, %v1492_v2 }
 0x1c7   :  { %v1061_v8 = vpop.f32.mrb[6].mxu1  ;;  %v396_v9 = vmul.f32 %v1498_v6, %v1496_v5 }
 0x1c8   :  { %v1506_v11 = vadd.f32 %v1061_v8, %v963_v0  ;;  %v387_v12 = vpop.f32.mrb[7].mxu1  ;;  %v404_v13 = vsel %vm400_vm7, %v397_v7, 0.0  ;;  %v747_v7 = vld [vmem:[%s1721_s5 + $0x40] sm:$0xff]  ;;  %v748_v8 = vld [vmem:[%s1721_s5 + $0x48] sm:$0xff] }
 0x1c9   :  { %v1509_v14 = vadd.f32 %v963_v0, %v387_v12  ;;  %405 = vadd.xlane.f32.xlu1 %v404_v13  ;;  %v401_v15 = vsel %vm400_vm7, %v396_v9, 0.0  ;;  %v744_v0 = vld [vmem:[%s1721_s5 + $0x28] sm:$0xff]  ;;  %v1158_v9 = vpack.c.bf16 %v748_v8, %v747_v7  ;;  %v750_v12 = vld [vmem:[%s1721_s5 + $0x58] sm:$0xff] }
 0x1ca   :  { %402 = vadd.xlane.f32.xlu0 %v401_v15  ;;  %v399_v17 = vmul.f32 %v1506_v11, %v1504_v10  ;;  %v1150_v1 = vpack.c.bf16 %v744_v0, %v743_v63  ;;  %v751_v15 = vld [vmem:[%s1721_s5 + $0x60] sm:$0xff] }
 0x1cb   :  { %v1070_v19 = vpop.f32.mrb[8].mxu1  ;;  %v398_v24 = vmul.f32 %v1509_v14, %v167_v18 }
 0x1cc   :  { %v1517_v20 = vadd.f32 %v1070_v19, %v973_v16  ;;  %v491_v21 = vpop.f32.mrb[9].mxu1  ;;  %v410_v22 = vsel %vm400_vm7, %v399_v17, 0.0  ;;  %1151 = vmatprep.subr.bf16.mxu0 %v1150_v1  ;;  %v753_v17 = vld [vmem:[%s1721_s5 + $0x70] sm:$0xff]  ;;  %v754_v19 = vld [vmem:[%s1721_s5 + $0x78] sm:$0xff] }
 0x1cd   :  { %v1520_v23 = vadd.f32 %v973_v16, %v491_v21  ;;  %v407_v31 = vsel %vm400_vm7, %v398_v24, 0.0  ;;  %1153 = vmatpush3.bf16.msra.mxu0 %v1150_v1  ;;  %v1170_v21 = vpack.c.bf16 %v754_v19, %v753_v17 }
 0x1ce   :  { %411 = vadd.xlane.f32.xlu0 %v410_v22  ;;  %v511_v25 = vmul.f32 %v1517_v20, %v1492_v2 }
 0x1cf   :  { %v1073_v26 = vpop.f32.mrb[10].mxu1  ;;  %v510_v33 = vmul.f32 %v1520_v23, %v1496_v5 }
 0x1d0   :  { %v1525_v27 = vadd.f32 %v1073_v26, %v973_v16  ;;  %v501_v28 = vpop.f32.mrb[11].mxu1  ;;  %v517_v29 = vsel %vm400_vm7, %v511_v25, 0.0 }
 0x1d1   :  { %v1528_v30 = vadd.f32 %v973_v16, %v501_v28  ;;  %518 = vadd.xlane.f32.xlu1 %v517_v29  ;;  %v514_v41 = vsel %vm400_vm7, %v510_v33, 0.0  ;;  %v752_v16 = vld [vmem:[%s1721_s5 + $0x68] sm:$0xff] }
 0x1d2   :  { %408 = vadd.xlane.f32.xlu0 %v407_v31  ;;  %v513_v34 = vmul.f32 %v1525_v27, %v1504_v10 }
 0x1d3   :  { %v1082_v35 = vpop.f32.mrb[12].mxu1  ;;  %v512_v39 = vmul.f32 %v1528_v30, %v167_v18 }
 0x1d4   :  { %v1538_v36 = vadd.f32 %v1082_v35, %v983_v32  ;;  %v604_v37 = vpop.f32.mrb[13].mxu1  ;;  %v523_v38 = vsel %vm400_vm7, %v513_v34, 0.0 }
 0x1d5   :  { %v1542_v40 = vadd.f32 %v983_v32, %v604_v37  ;;  %524 = vadd.xlane.f32.xlu1 %v523_v38  ;;  %v520_v46 = vsel %vm400_vm7, %v512_v39, 0.0 }
 0x1d6   :  { %515 = vadd.xlane.f32.xlu0 %v514_v41  ;;  %v624_v47 = vmul.f32 %v1538_v36, %v1492_v2  ;;  %v745_v2 = vld [vmem:[%s1721_s5 + $0x30] sm:$0xff] }
 0x1d7   :  { %v1085_v42 = vpop.f32.mrb[14].mxu1  ;;  %v623_v43 = vmul.f32 %v1542_v40, %v1496_v5  ;;  %v1154_v5 = vpack.c.bf16 %v746_v4, %v745_v2 }
 0x1d8   :  { %v1547_v44 = vadd.f32 %v1085_v42, %v983_v32  ;;  %v614_v45 = vpop.f32.mrb[15].mxu1  ;;  %v630_v51 = vsel %vm400_vm7, %v624_v47, 0.0 }
 0x1d9   :  { %v1552_v48 = vadd.f32 %v983_v32, %v614_v45  ;;  %521 = vadd.xlane.f32.xlu1 %v520_v46  ;;  %v627_v49 = vsel %vm400_vm7, %v623_v43, 0.0  ;;  %1155 = vmatprep.subr.bf16.mxu0 %v1154_v5 }
 0x1da   :  { %628 = vadd.xlane.f32.xlu0 %v627_v49  ;;  %v626_v52 = vmul.f32 %v1547_v44, %v1504_v10  ;;  %1157 = vmatpush3.bf16.msra.mxu0 %v1154_v5  ;;  %v749_v10 = vld [vmem:[%s1721_s5 + $0x50] sm:$0xff] }
 0x1db   :  { %v625_v50 = vmul.f32 %v1552_v48, %v167_v18  ;;  %1159 = vmatprep.subr.bf16.mxu0 %v1158_v9  ;;  %v1162_v13 = vpack.c.bf16 %v750_v12, %v749_v10  ;;  %v1166_v18 = vpack.c.bf16 %v752_v16, %v751_v15 }
 0x1dc   :  { %v636_v54 = vsel %vm400_vm7, %v626_v52, 0.0 }
 0x1dd   :  { %631 = vadd.xlane.f32.xlu1 %v630_v51  ;;  %v633_v53 = vsel %vm400_vm7, %v625_v50, 0.0 }
 0x1de   :  { %634 = vadd.xlane.f32.xlu0 %v633_v53  ;;  %1161 = vmatpush3.bf16.msra.mxu0 %v1158_v9 }
 0x1df   :  { %1163 = vmatprep.subr.bf16.mxu0 %v1162_v13 }
 0x1e1   :  { %637 = vadd.xlane.f32.xlu1 %v636_v54 }
 0x1e2   :  { %1165 = vmatpush3.bf16.msra.mxu0 %v1162_v13 }
 0x1e3   :  { %1167 = vmatprep.subr.bf16.mxu0 %v1166_v18 }
 0x1e6   :  { %1169 = vmatpush3.bf16.msra.mxu0 %v1166_v18 }
 0x1e7   :  { %1171 = vmatprep.subr.bf16.mxu0 %v1170_v21 }
 0x1ea   :  { %1173 = vmatpush3.bf16.msra.mxu0 %v1170_v21 }
 0x1f2   :  { %1183 = vrot.lane.b32.xlu1 %v1182_v55, %s1235_s21 }
 0x1f4   :  { %1178 = vrot.lane.b32.xlu0 %v1177_v58, %s1235_s21 }
 0x256   :  { %v1614_v24 = vpop.xlane.xlu1 %405 }
 0x257   :  { %v1612_v22 = vpop.xlane.xlu0 %402 }
 0x25b   :  { %v1616_v25 = vpop.xlane.xlu0 %411 }
 0x25e   :  { %v1618_v26 = vpop.xlane.xlu1 %518 }
 0x25f   :  { %v1620_v28 = vpop.xlane.xlu0 %408  ;;  %v640_v37 = vmax.f32 %v1614_v24, %v1618_v26 }
 0x262   :  { %v1622_v29 = vpop.xlane.xlu1 %524 }
 0x263   :  { %v1624_v31 = vpop.xlane.xlu0 %515  ;;  %v642_v52 = vmax.f32 %v1616_v25, %v1622_v29 }
 0x264   :  { %v639_v32 = vmax.f32 %v1612_v22, %v1624_v31 }
 0x266   :  { %v1628_v33 = vpop.xlane.xlu1 %521 }
 0x267   :  { %v1630_v34 = vpop.xlane.xlu0 %628  ;;  %v641_v38 = vmax.f32 %v1620_v28, %v1628_v33 }
 0x268   :  { %v643_v35 = vmax.f32 %v639_v32, %v1630_v34 }
 0x26a   :  { %v647_v39 = vsub.f32 %v1612_v22, %v643_v35  ;;  %v659_v41 = vsub.f32 %v1624_v31, %v643_v35  ;;  %v671_v42 = vsub.f32 %v1630_v34, %v643_v35  ;;  %v1640_v43 = vpop.xlane.xlu1 %631 }
 0x26b   :  { %v644_v45 = vmax.f32 %v640_v37, %v1640_v43  ;;  %v1643_v46 = vpop.xlane.xlu0 %634 }
 0x26c   :  { %v651_v47 = vmul.f32 1.442695, %v647_v39  ;;  %v663_v49 = vmul.f32 1.442695, %v659_v41  ;;  %v675_v50 = vmul.f32 1.442695, %v671_v42  ;;  %v645_v51 = vmax.f32 %v641_v38, %v1643_v46 }
 0x26d   :  { %v648_v53 = vsub.f32 %v1614_v24, %v644_v45  ;;  %v660_v54 = vsub.f32 %v1618_v26, %v644_v45  ;;  %v672_v55 = vsub.f32 %v1640_v43, %v644_v45 }
 0x26e   :  { %1187 = vpow2.f32 %v651_v47  ;;  %v649_v56 = vsub.f32 %v1620_v28, %v645_v51  ;;  %v661_v57 = vsub.f32 %v1628_v33, %v645_v51  ;;  %v673_v58 = vsub.f32 %v1643_v46, %v645_v51  ;;  %v1654_v59 = vpop.xlane.xlu1 %637 }
 0x26f   :  { %1189 = vpow2.f32 %v663_v49  ;;  %v653_v60 = vmul.f32 1.442695, %v648_v53  ;;  %v665_v61 = vmul.f32 1.442695, %v660_v54  ;;  %v677_v62 = vmul.f32 1.442695, %v672_v55 }
 0x270   :  { %1191 = vpow2.f32 %v675_v50  ;;  %v655_v63 = vmul.f32 1.442695, %v649_v56  ;;  %v667_v0 = vmul.f32 1.442695, %v661_v57  ;;  %v646_v1 = vmax.f32 %v642_v52, %v1654_v59  ;;  %v1179_v56 = vpop.permute.xlu0 %1178 }
 0x271   :  { %1193 = vpow2.f32 %v653_v60  ;;  %v679_v2 = vmul.f32 1.442695, %v673_v58 }
 0x272   :  { %1195 = vpow2.f32 %v665_v61  ;;  %v650_v4 = vsub.f32 %v1616_v25, %v646_v1  ;;  %v662_v5 = vsub.f32 %v1622_v29, %v646_v1  ;;  %v674_v7 = vsub.f32 %v1654_v59, %v646_v1 }
 0x273   :  { %1197 = vpow2.f32 %v677_v62  ;;  %v1180_v61 = vunpack.i.l.bf16 %v1179_v56 }
 0x274   :  { %1199 = vpow2.f32 %v655_v63  ;;  %v657_v8 = vmul.f32 1.442695, %v650_v4  ;;  %v669_v9 = vmul.f32 1.442695, %v662_v5  ;;  %v681_v10 = vmul.f32 1.442695, %v674_v7  ;;  %v1184_v5 = vpop.permute.xlu1 %1183 }
 0x275   :  { %1201 = vpow2.f32 %v667_v0  ;;  %v1181_v4 = vunpack.i.h.bf16 %v1179_v56 }
 0x276   :  { %1203 = vpow2.f32 %v679_v2 }
 0x277   :  { %1205 = vpow2.f32 %v657_v8 }
 0x278   :  { %v1188_v12 = vpop.eup %1187  ;;  %1207 = vpow2.f32 %v669_v9 }
 0x279   :  { %v1190_v13 = vpop.eup %1189  ;;  %1209 = vpow2.f32 %v681_v10  ;;  %v695_v39 = vmul.f32 %v1188_v12, %v1498_v6  ;;  %v1185_v10 = vunpack.i.l.bf16 %v1184_v5 }
 0x27a   :  { %v1192_v15 = vpop.eup %1191  ;;  %v683_v16 = vadd.f32 %v1190_v13, %v1188_v12  ;;  %v699_v41 = vmul.f32 %v1190_v13, %v1520_v23 }
 0x27b   :  { %v1194_v17 = vpop.eup %1193  ;;  %v703_v6 = vmul.f32 %v1192_v15, %v1542_v40 }
 0x27c   :  { %v1196_v18 = vpop.eup %1195  ;;  %v687_v19 = vadd.f32 %v1192_v15, %v683_v16  ;;  %v696_v51 = vmul.f32 %v1194_v17, %v1494_v3  ;;  %v707_v54 = vadd.f32 %v699_v41, %v695_v39  ;;  %v1186_v15 = vunpack.i.h.bf16 %v1184_v5  ;;  %v991_v39 = vld [vmem:[%s1721_s5 + $0x82] ss:$0 sm:$0xff] }
 0x27d   :  { %v1198_v21 = vpop.eup %1197  ;;  %v684_v32 = vadd.f32 %v1196_v18, %v1194_v17  ;;  %v700_v52 = vmul.f32 %v1196_v18, %v1517_v20 }
 0x27e   :  { %v1200_v35 = vpop.eup %1199  ;;  %1211 = vrcp.f32 %v687_v19  ;;  %v711_v62 = vadd.f32 %v707_v54, %v703_v6  ;;  %v704_v3 = vmul.f32 %v1198_v21, %v1538_v36 }
 0x27f   :  { %v1202_v37 = vpop.eup %1201  ;;  %v688_v38 = vadd.f32 %v1198_v21, %v684_v32  ;;  %v697_v23 = vmul.f32 %v1200_v35, %v1509_v14  ;;  %v708_v60 = vadd.f32 %v700_v52, %v696_v51  ;;  %v989_v21 = vld [vmem:[%s1721_s5 + $0x80] ss:$0 sm:$0xff]  ;;  %v867_v51 = vmul.f32 %v991_v39, %v1630_v34 }
 0x280   :  { %v1204_v42 = vpop.eup %1203  ;;  %v685_v45 = vadd.f32 %v1202_v37, %v1200_v35  ;;  %v701_v58 = vmul.f32 %v1202_v37, %v1528_v30  ;;  %v761_v32 = vmul.f32 %v989_v21, %v1614_v24  ;;  %v760_v37 = vmul.f32 %v989_v21, %v1612_v22  ;;  %v992_v22 = vld [vmem:[%s1721_s5 + $0x83] ss:$0 sm:$0xff] }
 0x281   :  { %v1206_v47 = vpop.eup %1205  ;;  %1213 = vrcp.f32 %v688_v38  ;;  %v712_v40 = vadd.f32 %v708_v60, %v704_v3  ;;  %v705_v30 = vmul.f32 %v1204_v42, %v1552_v48  ;;  %v763_v52 = vmul.f32 %v989_v21, %v1616_v25 }
 0x282   :  { %v1208_v49 = vpop.eup %1207  ;;  %v689_v50 = vadd.f32 %v1204_v42, %v685_v45  ;;  %v698_v20 = vmul.f32 %v1206_v47, %v1506_v11  ;;  %v709_v2 = vadd.f32 %v701_v58, %v697_v23  ;;  %v870_v58 = vmul.f32 %v991_v39, %v1654_v59 }
 0x283   :  { %v686_v53 = vadd.f32 %v1208_v49, %v1206_v47  ;;  %v1210_v55 = vpop.eup %1209  ;;  %v702_v0 = vmul.f32 %v1208_v49, %v1525_v27  ;;  %v868_v49 = vmul.f32 %v991_v39, %v1640_v43  ;;  %v869_v60 = vmul.f32 %v991_v39, %v1643_v46 }
 0x284   :  { %1215 = vrcp.f32 %v689_v50  ;;  %v713_v12 = vadd.f32 %v709_v2, %v705_v30  ;;  %v706_v27 = vmul.f32 %v1210_v55, %v1547_v44  ;;  %v990_v44 = vld [vmem:[%s1721_s5 + $0x81] ss:$0 sm:$0xff] }
 0x285   :  { %v690_v57 = vadd.f32 %v1210_v55, %v686_v53  ;;  %v710_v9 = vadd.f32 %v702_v0, %v698_v20  ;;  %v855_v38 = vmul.f32 %v990_v44, %v1618_v26  ;;  %v854_v45 = vmul.f32 %v990_v44, %v1624_v31 }
 0x286   :  { %v762_v55 = vmul.f32 %v989_v21, %v1620_v28  ;;  %v857_v31 = vmul.f32 %v990_v44, %v1622_v29  ;;  %v856_v34 = vmul.f32 %v990_v44, %v1628_v33 }
 0x287   :  { %1217 = vrcp.f32 %v690_v57  ;;  %v714_v16 = vadd.f32 %v710_v9, %v706_v27 }
 0x288   :  { %v1212_v63 = vpop.eup %1211 }
 0x289   :  { %v715_v1 = vmul.f32 %v1212_v63, %v711_v62 }
 0x28b   :  { %v1214_v7 = vpop.eup %1213  ;;  %v735_v14 = vsel %vm400_vm7, %v715_v1, %v1180_v61 }
 0x28c   :  { %1118 = vmatprep.mubr.f32.mxu0 %v735_v14  ;;  %v716_v8 = vmul.f32 %v1214_v7, %v712_v40 }
 0x28e   :  { %v1216_v36 = vpop.eup %1215  ;;  %v736_v11 = vsel %vm400_vm7, %v716_v8, %v1181_v4 }
 0x28f   :  { %1119 = vmatmul.mubr.f32.vlgmr.msra.gmra.mrb[0].mxu0 %v736_v11  ;;  %v717_v13 = vmul.f32 %v1216_v36, %v713_v12 }
 0x291   :  { %v1218_v17 = vpop.eup %1217  ;;  %v737_v18 = vsel %vm400_vm7, %v717_v13, %v1185_v10 }
 0x292   :  { %1121 = vmatprep.mubr.f32.mxu0 %v737_v18  ;;  %v718_v19 = vmul.f32 %v1218_v17, %v714_v16 }
 0x294   :  { %v738_v48 = vsel %vm400_vm7, %v718_v19, %v1186_v15 }
 0x295   :  { %1122 = vmatmul.mubr.f32.gmra.mrb[2].mxu0 %v738_v48 }
 0x362   :  { %v1120_v35 = vpop.f32.mrb[0].mxu0 }
 0x363   :  { %v836_v41 = vadd.f32 %v1120_v35, %v761_v32  ;;  %v830_v42 = vpop.f32.mrb[1].mxu0 }
 0x364   :  { %v831_v47 = vadd.f32 %v830_v42, %v760_v37 }
 0x365   :  { %v859_v50 = vadd.f32 %v855_v38, %v836_v41 }
 0x366   :  { %v858_v24 = vadd.f32 %v854_v45, %v831_v47 }
 0x367   :  { %v872_v26 = vadd.f32 %v868_v49, %v859_v50 }
 0x368   :  { %v871_v53 = vadd.f32 %v867_v51, %v858_v24  ;;  %v1123_v54 = vpop.f32.mrb[2].mxu0 }
 0x369   :  { %v881_v56 = vadd.f32 %v992_v22, %v872_v26  ;;  %v846_v43 = vadd.f32 %v1123_v54, %v763_v52  ;;  %v840_v57 = vpop.f32.mrb[3].mxu0 }
 0x36a   :  { %v880_v6 = vadd.f32 %v992_v22, %v871_v53  ;;  %v841_v23 = vadd.f32 %v840_v57, %v762_v55 }
 0x36b   :  { %886 = vst.msk [vmem:[%s1722_s6 + $0x8] sm:$0xff] %vm884_vm8, %v881_v56  ;;  %v861_v25 = vadd.f32 %v857_v31, %v846_v43 }
 0x36c   :  { %885 = vst.msk [vmem:[%s1722_s6] sm:$0xff] %vm884_vm8, %v880_v6  ;;  %v860_v28 = vadd.f32 %v856_v34, %v841_v23 }
 0x36d   :  { %v874_v29 = vadd.f32 %v870_v58, %v861_v25 }
 0x36e   :  { %v873_v33 = vadd.f32 %v869_v60, %v860_v28 }
 0x36f   :  { %v883_v61 = vadd.f32 %v992_v22, %v874_v29 }
 0x370   :  { %v882_v62 = vadd.f32 %v992_v22, %v873_v33 }
 0x371   :  { %888 = vst.msk [vmem:[%s1722_s6 + $0x18] sm:$0xff] %vm884_vm8, %v883_v61 }
 0x372   :  { %887 = vst.msk [vmem:[%s1722_s6 + $0x10] sm:$0xff] %vm884_vm8, %v882_v62 }
 0x373   :  { %893 = vsyncpa [#allocation4], 1 }

</bundles_post_ra>
